<compile_context>
chip_gen: v7x
topology: tpu7x:2x2x1
jax: 0.10.0
libtpu: 0.0.40
codegen_flags: <defaults>
</compile_context>

<pallas_src>
import jax
import jax.numpy as jnp
from jax.experimental import pallas as pl
from jax.experimental.pallas import tpu as pltpu


def _affine_kernel(params_ref, x_ref, o_ref):
    # params_ref: SMEM (2,)  -> [weight, bias]
    # x_ref / o_ref: VMEM (tile_rows, lanes) lane-dense tiles
    w = params_ref[0]
    b = params_ref[1]
    o_ref[...] = x_ref[...] * w + b


def receipts_predictor_forward(x, weight, bias, *, lanes=1024, tile_rows=256):
    """Pallas implementation of y = x @ weight.T + bias for Linear(1, 1).

    x:      (N, 1) float32
    weight: (1, 1) float32
    bias:   (1,)   float32
    returns (N, 1) float32
    """
    n, f = x.shape
    assert f == 1 and weight.shape == (1, 1) and bias.shape == (1,)

    # Single flattened scalar-parameter array for SMEM.
    params = jnp.concatenate([weight.reshape(-1), bias.reshape(-1)]).astype(x.dtype)

    # ---- lane-dense slab layout (layout plumbing only, no extra compute) ----
    flat = x.reshape(-1)
    rows = pl.cdiv(n, lanes)                      # rows of the lane-dense slab
    tr = min(tile_rows, rows)                     # row tile (256 -> 1 MiB f32 tiles)
    padded_rows = pl.cdiv(rows, tr) * tr          # make rows divisible by the tile
    padded_total = padded_rows * lanes
    flat = jnp.pad(flat, (0, padded_total - n))
    slab = flat.reshape(padded_rows, lanes)

    grid = (padded_rows // tr,)

    out = pl.pallas_call(
        _affine_kernel,
        out_shape=jax.ShapeDtypeStruct((padded_rows, lanes), x.dtype),
        grid=grid,
        in_specs=[
            pl.BlockSpec(memory_space=pltpu.MemorySpace.SMEM),      # params (2,)
            pl.BlockSpec((tr, lanes), lambda i: (i, 0)),            # x tile
        ],
        out_specs=pl.BlockSpec((tr, lanes), lambda i: (i, 0)),      # y tile
        compiler_params=pltpu.CompilerParams(
            dimension_semantics=("parallel",),   # shard rows across TCs (v7x)
        ),
    )(params, slab)

    # Trim padding, restore the (N, 1) API-boundary view.
    return out.reshape(-1)[:n].reshape(n, 1)


if __name__ == "__main__":
    key = jax.random.PRNGKey(0)
    kx, kw, kb, kx2 = jax.random.split(key, 4)

    # Deterministic synthetic parameters (shapes from nn.Linear(1, 1)).
    weight = jax.random.uniform(kw, (1, 1), jnp.float32, -1.0, 1.0)
    bias = jax.random.uniform(kb, (1,), jnp.float32, -1.0, 1.0)

    # Small batch of 8 "receipt" scalars, shape (8, 1) — matches the module's
    # forward (nn.Linear(1, 1) applied to (N, 1) inputs).
    x = jax.random.normal(kx, (8, 1), jnp.float32)
    y = jax.block_until_ready(receipts_predictor_forward(x, weight, bias))
    y_ref = x @ weight.T + bias
    assert y.shape == y_ref.shape
    assert jnp.allclose(y, y_ref, atol=1e-6, rtol=1e-6)

    # Second check: a modest N with a small row tile to exercise the padded,
    # multi-step tiled grid path (default tile_rows=256 stays performant).
    x2 = jax.random.normal(kx2, (2500, 1), jnp.float32)
    y2 = jax.block_until_ready(
        receipts_predictor_forward(x2, weight, bias, lanes=128, tile_rows=8)
    )
    y2_ref = x2 @ weight.T + bias
    assert y2.shape == y2_ref.shape
    assert jnp.allclose(y2, y2_ref, atol=1e-6, rtol=1e-6)

    print("KERNEL_OK")
</pallas_src>

<mosaic_0001>
module attributes {stable_mosaic.version = 11 : i64} {
  func.func @_affine_kernel(%arg0: i32, %arg1: memref<2xf32, #tpu.memory_space<smem>>, %arg2: memref<1x1024xf32, #tpu.memory_space<vmem>>, %arg3: memref<1x1024xf32, #tpu.memory_space<vmem>>) attributes {dimension_semantics = [#tpu.dimension_semantics<parallel>], iteration_bounds = array<i64: 1>, scalar_prefetch = 0 : i64, scratch_operands = 0 : i64, tpu.core_type = #tpu.core_type<tc>, window_params = [{transform_indices = @transform_0, window_bounds = array<i64: 2>}, {transform_indices = @transform_1, window_bounds = array<i64: 1, 1024>}, {transform_indices = @transform_2, window_bounds = array<i64: 1, 1024>}]} {
    %c0 = arith.constant 0 : index
    %0 = memref.load %arg1[%c0] : memref<2xf32, #tpu.memory_space<smem>>
    %c1 = arith.constant 1 : index
    %1 = memref.load %arg1[%c1] : memref<2xf32, #tpu.memory_space<smem>>
    %c0_0 = arith.constant 0 : index
    %c0_1 = arith.constant 0 : index
    %2 = vector.load %arg2[%c0_0, %c0_1] : memref<1x1024xf32, #tpu.memory_space<vmem>>, vector<1x1024xf32>
    %3 = vector.broadcast %0 : f32 to vector<1x1024xf32>
    %4 = arith.mulf %2, %3 : vector<1x1024xf32>
    %5 = vector.broadcast %1 : f32 to vector<1x1024xf32>
    %6 = arith.addf %4, %5 : vector<1x1024xf32>
    %c0_2 = arith.constant 0 : index
    %c0_3 = arith.constant 0 : index
    %7 = vector.load %arg3[%c0_2, %c0_3] : memref<1x1024xf32, #tpu.memory_space<vmem>>, vector<1x1024xf32>
    tpu.vector_store %arg3[%c0_2, %c0_3], %6 {strides = array<i32>} : memref<1x1024xf32, #tpu.memory_space<vmem>>, vector<1x1024xf32>,
    return
  }
  func.func @transform_0(%arg0: i32) -> i32 {
    %c0_i32 = arith.constant 0 : i32
    %c0_i32_0 = arith.constant 0 : i32
    return %c0_i32 : i32
  }
  func.func @transform_1(%arg0: i32) -> (i32, i32) {
    %c0_i32 = arith.constant 0 : i32
    %c0_i32_0 = arith.constant 0 : i32
    return %arg0, %c0_i32 : i32, i32
  }
  func.func @transform_2(%arg0: i32) -> (i32, i32) {
    %c0_i32 = arith.constant 0 : i32
    %c0_i32_0 = arith.constant 0 : i32
    return %arg0, %c0_i32 : i32, i32
  }
}

</mosaic_0001>

<bundles_post_ra>
// kernel: tpu_custom_call.1
= control target key start
LH: loop header
LB: loop body
LE: loop exit
PB: predicated region body
PF: predicated region fallthrough
CT: control target
= control target key end

     0   :  { %7 = vsyncpa [#allocation5], 0  ;;  %s177_s0 = inlined_call_operand.hbm [shape: f32[2], index: 0, kind: input, shape index: {}]   ;;  %s178_s1 = inlined_call_operand.hbm [shape: f32[1,1024], index: 1, kind: input, shape index: {}]   ;;  %s179_s2 = inlined_call_operand.hbm [shape: f32[1,1024], index: 2, kind: output, shape index: {}]  }
   0x1   :  { %8 = vsyncpa [#allocation3], 0 }
   0x2   :  { %9 = vsyncpa [#allocation4], 0  ;;  %s63_s11 = scalar_lea.hbm %s177_s0, 16 }
   0x3   :  { %p64_p0 = scmp.ne.s32.totalorder %s177_s0, %s63_s11  ;;  %p67_p1 = scmp.lt.u32.totalorder %s63_s11, %s177_s0 }
   0x5   :  { %p69_p2 = pnand %p67_p1, %p64_p0 }
   0x7   :  { %72 = shalt.err (!%p69_p2)
}
   0x8   :  { %s123_s16 = smov [#allocation2]   ;;  %s124_s19 = smov [#allocation6]  }
   0x9   :  { %17 = dma.hbm_to_smem %s177_s0, 16, %s123_s16, [#allocation5]  }
   0xa   :  { %s24_s20 = sshll.u32 %s124_s19, 4  ;;  %s73_s23 = scalar_lea.hbm %s178_s1, 128  ;;  %s25_s20 = int_to_ptr.vmem [resolvable:$true] %s24_s20 }
   0xb   :  { %p74_p3 = scmp.ne.s32.totalorder %s178_s1, %s73_s23  ;;  %p77_p4 = scmp.lt.u32.totalorder %s73_s23, %s178_s1 }
   0xd   :  { %p79_p5 = pnand %p77_p4, %p74_p3 }
   0xf   :  { %82 = shalt.err (!%p79_p5)
}
  0x10   :  { %s83_s28 = scalar_lea.vmem %s25_s20, 128  ;;  %p88_p7 = scmp.lt.s32.totalorder %s25_s20, %s25_s20 }
  0x11   :  { %p84_p6 = scmp.ne.s32.totalorder %s25_s20, %s83_s28  ;;  %p89_p8 = scmp.lt.s32.totalorder %s83_s28, %s83_s28 }
  0x13   :  { %p90_p9 = por %p89_p8, %p88_p7 }
  0x15   :  { %p91_p10 = pnand %p90_p9, %p84_p6 }
  0x17   :  { %94 = shalt.err (!%p91_p10)
}
  0x18   :  { %27 = dma.hbm_to_vmem [thread:$0]  %s178_s1, 128, %s25_s20, [#allocation3]  }
  0x19   :  { %117 = dma.done.wait [#allocation5], 16  }
  0x1a   :  { %118 = vsyncadd [#allocation5], 4294967280 }
  0x1b   :  { %119 = dma.done.wait [#allocation3], 128  }
  0x1c   :  { %120 = vsyncadd [#allocation3], 4294967168 }
  0x1d   :  { %34 = sfence }
  0x1e   :  { %s35_s30 = sld [smem:[#allocation2]]  ;;  %s59_s3 = sld [smem:[#allocation2 + $0x1]]  ;;  %v37_v0 = vld [vmem:[#allocation6] sm:$0xff] }
  0x1f   :  { %s125_s4 = smov [#allocation7]  }
  0x20   :  { %s49_s5 = sshll.u32 %s125_s4, 4  ;;  %s50_s5 = int_to_ptr.vmem [resolvable:$true] %s49_s5 }
  0x21   :  { %s95_s6 = scalar_lea.vmem %s50_s5, 128  ;;  %p100_p12 = scmp.lt.s32.totalorder %s50_s5, %s50_s5 }
  0x22   :  { %p96_p11 = scmp.ne.s32.totalorder %s50_s5, %s95_s6  ;;  %p101_p13 = scmp.lt.s32.totalorder %s95_s6, %s95_s6 }
  0x24   :  { %v38_v1 = vstv %s35_s30  ;;  %v40_v2 = vstv %s59_s3  ;;  %p102_p0 = por %p101_p13, %p100_p12 }
  0x25   :  { %v39_v3 = vmul.f32 %v38_v1, %v37_v0 }
  0x26   :  { %p103_p1 = pnand %p102_p0, %p96_p11 }
  0x27   :  { %v41_v4 = vadd.f32 %v40_v2, %v39_v3 }
  0x29   :  { %42 = vst [vmem:[#allocation7] sm:$0xff] %v41_v4 }
  0x2a   :  { %106 = shalt.err (!%p103_p1)
}
  0x2b   :  { %s107_s8 = scalar_lea.hbm %s179_s2, 128 }
  0x2c   :  { %p108_p2 = scmp.ne.s32.totalorder %s179_s2, %s107_s8  ;;  %p111_p3 = scmp.lt.u32.totalorder %s107_s8, %s179_s2 }
  0x2e   :  { %p113_p4 = pnand %p111_p3, %p108_p2 }
  0x30   :  { %116 = shalt.err (!%p113_p4)
}
  0x31   :  { %52 = dma.vmem_to_hbm [thread:$0]  %s50_s5, 128, %s179_s2, [#allocation4]  }
  0x32   :  { %121 = dma.done.wait [#allocation4], 128  }
  0x33   :  { %122 = vsyncadd [#allocation4], 4294967168 }
  0x34   :  { %56 = vsyncpa [#allocation3], 1 }
  0x35   :  { %57 = vsyncpa [#allocation4], 1 }
  0x36   :  { %58 = vsyncpa [#allocation5], 1 }

</bundles_post_ra>
